<compile_context>
chip_gen: v7x
topology: tpu7x:2x2x1
jax: 0.10.0
libtpu: 0.0.40
codegen_flags: <defaults>
</compile_context>

<pallas_src>
import functools

import jax
import jax.numpy as jnp
import numpy as np
from jax.experimental import pallas as pl
from jax.experimental.pallas import tpu as pltpu

BN_EPS = 1e-5
LANE = 128


def _round_up(x, m):
    return ((x + m - 1) // m) * m


# ------------------------------ fused Pallas kernel ------------------------------ #
def _fused_classifier_kernel(x_ref, *refs, n_layers, n_classes, has_cov):
    """Whole classifier MLP in one kernel (eval mode).

    refs = [wm_0, b_0, (covb_0), wm_1, b_1, (covb_1), ..., o_ref]
    BatchNorm is pre-folded into (wm, b); covariate injection is a precomputed per-example
    bias (covb) added only for layers with has_cov[i] (trace-time guard).  Each layer:
        y = c @ wm (+ covb) + b
    followed by ReLU (hidden layers) or masked softmax / sigmoid (final layer).
    All intermediates stay in VMEM; only the final lane-dense block is stored.
    """
    o_ref = refs[-1]
    p = refs[:-1]

    c = x_ref[...]                                   # f32 activations
    idx = 0
    for i in range(n_layers):
        wm = p[idx][...]; idx += 1                   # (K_pad, out_pad_i), f32 or bf16
        b_ref = p[idx]; idx += 1                     # (1, out_pad_i), f32
        # MXU matmul; activations cast to the weight dtype, accumulate in f32.
        y = jnp.dot(c.astype(wm.dtype), wm, preferred_element_type=jnp.float32)
        if has_cov[i]:                               # static (trace-time) guard
            y = y + p[idx][...]; idx += 1            # per-example covariate bias (f32)
        y = y + b_ref[...]
        if i < n_layers - 1:
            c = jnp.maximum(y, 0.0)                  # ReLU; Dropout(p) identity in eval mode
        else:
            if n_classes > 2:
                if y.shape[1] > n_classes:
                    # Mask padded logit lanes so they do not corrupt the softmax.
                    col = jax.lax.broadcasted_iota(jnp.int32, y.shape, 1)
                    y = jnp.where(col < n_classes, y, -1e30)
                m = jnp.max(y, axis=1, keepdims=True)
                e = jnp.exp(y - m)
                s = jnp.sum(e, axis=1, keepdims=True)
                c = e / s                            # exact division: rows sum to 1
            else:
                c = 1.0 / (1.0 + jnp.exp(-y))        # Sigmoid head
    o_ref[...] = c


# ------------------------------ parameter construction --------------------------- #
def init_classifier_params(key, in_features, n_classes, n_cat_list,
                           hidden_layers, neurons_per_layer, inject_covariates=True):
    """Unfolded, torch-like parameters (one dict per block) + metadata."""
    n_cat_list = [c if c > 1 else 0 for c in (n_cat_list or [])]
    cat_dim = sum(n_cat_list)
    layer_dims = [neurons_per_layer] * hidden_layers
    main_ins = [in_features] + layer_dims[:-1] + [layer_dims[-1]]
    outs = layer_dims + [n_classes]
    # Block 0 always sees the covariates; later blocks only if inject_covariates.
    has_cat = [cat_dim > 0] + [cat_dim > 0 and inject_covariates] * (len(outs) - 1)

    params = []
    for mi, do, hc in zip(main_ins, outs, has_cat):
        din = mi + (cat_dim if hc else 0)
        key, k1, k2, k3, k4, k5, k6 = jax.random.split(key, 7)
        bound = 1.0 / np.sqrt(din)                      # PyTorch Linear default init
        W = jax.random.uniform(k1, (din, do), jnp.float32, -bound, bound)
        b = jax.random.uniform(k2, (1, do), jnp.float32, -bound, bound)
        # Non-trivial BN params so the host-side BN folding is actually exercised.
        gamma = 1.0 + 0.1 * jax.random.normal(k3, (1, do), jnp.float32)
        beta = 0.1 * jax.random.normal(k4, (1, do), jnp.float32)
        rmean = 0.1 * jax.random.normal(k5, (1, do), jnp.float32)
        rvar = jnp.exp(0.1 * jax.random.normal(k6, (1, do), jnp.float32))
        params.append(dict(W=W, b=b, gamma=gamma, beta=beta, rmean=rmean, rvar=rvar,
                           main_in=mi, out=do, has_cat=hc))
    meta = dict(n_cat_list=n_cat_list, cat_dim=cat_dim, n_classes=n_classes,
                inject_covariates=inject_covariates, in_features=in_features)
    return params, meta


def fold_and_pad_params(params, meta, matmul_dtype=jnp.float32):
    """Fold eval-mode BN into Linear, split W into main/cat rows, pad per-layer lane widths.

    matmul_dtype: jnp.float32 for exact parity, jnp.bfloat16 for v6e/v7x MXU throughput
    (accumulation and the epilogue always stay f32 inside the kernel).
    """
    cat_dim = meta["cat_dim"]
    layers = []
    prev_pad = None
    for i, p in enumerate(params):
        mi, do = p["main_in"], p["out"]
        out_pad = _round_up(do, LANE)                                 # per-layer padding
        scale = p["gamma"] * jax.lax.rsqrt(p["rvar"] + BN_EPS)        # (1, do)
        Wf = p["W"] * scale                                           # BN folded into W
        bf = (p["b"] - p["rmean"]) * scale + p["beta"]                # BN folded into b

        # Main-input rows: in_features for layer 0, previous layer's padded width after.
        row_pad = mi if i == 0 else prev_pad
        wm = (jnp.zeros((row_pad, out_pad), jnp.float32)
              .at[:mi, :do].set(Wf[:mi]).astype(matmul_dtype))
        b = jnp.zeros((1, out_pad), jnp.float32).at[:, :do].set(bf)

        # Covariate rows stay f32 on the host; they only feed the precomputed covb bias.
        if p["has_cat"] and cat_dim > 0:
            wc = jnp.zeros((cat_dim, out_pad), jnp.float32).at[:, :do].set(Wf[mi:])
        else:
            wc = None
        layers.append(dict(wm=wm, b=b, wc=wc, out_pad=out_pad))
        prev_pad = out_pad

    return dict(layers=layers, n_layers=len(params), n_classes=meta["n_classes"],
                cat_dim=cat_dim, n_cat_list=list(meta["n_cat_list"]))


# ------------------------------------ forward ------------------------------------- #
def classifier_forward(x, cat_list, fused, batch_tile=256):
    B, in_features = x.shape
    n_classes = fused["n_classes"]
    out_pad_last = fused["layers"][-1]["out_pad"]

    # Batch tiling: pad B up to a multiple of the (sublane-aligned) tile.
    bt = min(batch_tile, _round_up(B, 8))
    B_pad = _round_up(B, bt)
    grid = (B_pad // bt,)

    x_p = x if B_pad == B else jnp.pad(x, ((0, B_pad - B), (0, 0)))

    # One-hot covariates built ONCE on the host (tiny); padded rows are zero.
    kept = [(n, c) for n, c in zip(fused["n_cat_list"], cat_list) if n > 1]
    onehot = None
    if kept and fused["cat_dim"] > 0:
        onehot = jnp.concatenate(
            [jax.nn.one_hot(c.reshape(-1), n, dtype=jnp.float32) for n, c in kept], axis=1)
        if B_pad != B:
            onehot = jnp.pad(onehot, ((0, B_pad - B), (0, 0)))

    flat = []
    in_specs = [pl.BlockSpec((bt, in_features), lambda i: (i, 0))]
    vmem_tiles = [2 * bt * in_features * 4]          # double-buffered x tile
    has_cov = []
    flops = 0
    for layer in fused["layers"]:
        wm, b, wc, out_pad = layer["wm"], layer["b"], layer["wc"], layer["out_pad"]
        flat.append(wm)
        in_specs.append(pl.BlockSpec(wm.shape, lambda i: (0, 0)))     # resident weight block
        vmem_tiles.append(2 * wm.size * wm.dtype.itemsize)
        flat.append(b)
        in_specs.append(pl.BlockSpec(b.shape, lambda i: (0, 0)))
        vmem_tiles.append(2 * b.size * 4)
        if wc is not None and onehot is not None:
            covb = onehot @ wc                       # (B_pad, out_pad) per-example cov bias
            flat.append(covb)
            in_specs.append(pl.BlockSpec((bt, out_pad), lambda i: (i, 0)))
            vmem_tiles.append(2 * bt * out_pad * 4)
            has_cov.append(True)
        else:
            has_cov.append(False)                    # statically skipped in the kernel
        flops += 2 * B_pad * wm.shape[0] * wm.shape[1]
    vmem_tiles.append(2 * bt * out_pad_last * 4)     # output tile

    # Explicit VMEM budget for the all-resident-weights design (2x margin for activations
    # / compiler temporaries), clamped to a sane range.
    vmem_limit = int(min(max(2 * sum(vmem_tiles), 8 * 2**20), 128 * 2**20))

    cost = pl.CostEstimate(
        flops=int(flops),
        transcendentals=int(B_pad * out_pad_last),   # exp in the softmax / sigmoid head
        bytes_accessed=int(sum(a.size * a.dtype.itemsize for a in flat)
                           + x_p.size * 4 + B_pad * out_pad_last * 4))

    kernel = functools.partial(
        _fused_classifier_kernel,
        n_layers=fused["n_layers"], n_classes=n_classes, has_cov=tuple(has_cov))

    out = pl.pallas_call(
        kernel,
        out_shape=jax.ShapeDtypeStruct((B_pad, out_pad_last), jnp.float32),
        grid=grid,
        in_specs=in_specs,
        out_specs=pl.BlockSpec((bt, out_pad_last), lambda i: (i, 0)),
        compiler_params=pltpu.CompilerParams(
            dimension_semantics=("parallel",),       # batch axis shards across v7x's 2 TCs
            vmem_limit_bytes=vmem_limit),
        cost_estimate=cost,
    )(x_p, *flat)
    return out[:B, :n_classes]


# ------------------------------------ reference ------------------------------------ #
def classifier_forward_ref(x, cat_list, params, n_cat_list, cat_dim, n_classes,
                           inject_covariates=True):
    if cat_dim > 0:
        categs = jnp.concatenate(
            [jax.nn.one_hot(c.reshape(-1), n, dtype=jnp.float32)
             for n, c in zip(n_cat_list, cat_list) if n > 1], axis=1)
        c = jnp.concatenate([x, categs], axis=1)
    else:
        categs, c = None, x
    n_blocks = len(params)
    for i, p in enumerate(params):
        inp = jnp.concatenate([c, categs], axis=1) if (
            i > 0 and cat_dim > 0 and inject_covariates) else c
        y = inp @ p["W"] + p["b"]
        y = (y - p["rmean"]) / jnp.sqrt(p["rvar"] + BN_EPS) * p["gamma"] + p["beta"]
        if i < n_blocks - 1:
            c = jnp.maximum(y, 0.0)
        else:
            c = jax.nn.softmax(y, axis=1) if n_classes > 2 else jax.nn.sigmoid(y)
    return c


# -------------------------------------- main ---------------------------------------- #
if __name__ == "__main__":
    B = 8
    in_features = 32
    n_classes = 4
    n_cat_list = [3, 2]
    hidden_layers = 2
    neurons_per_layer = 32

    key = jax.random.PRNGKey(0)
    kx, kc0, kc1, kp = jax.random.split(key, 4)

    x = jax.random.normal(kx, (B, in_features), jnp.float32)
    cat0 = jax.random.randint(kc0, (B, 1), 0, n_cat_list[0], jnp.int32)
    cat1 = jax.random.randint(kc1, (B, 1), 0, n_cat_list[1], jnp.int32)
    cat_list = [cat0, cat1]

    params, meta = init_classifier_params(
        kp, in_features, n_classes, n_cat_list, hidden_layers, neurons_per_layer)
    ref = classifier_forward_ref(x, cat_list, params, meta["n_cat_list"],
                                 meta["cat_dim"], n_classes)

    # f32 MXU path: exact parity with the reference (default).
    fused_f32 = fold_and_pad_params(params, meta, matmul_dtype=jnp.float32)
    out_f32 = jax.block_until_ready(classifier_forward(x, cat_list, fused_f32))
    assert out_f32.shape == (B, n_classes)
    np.testing.assert_allclose(np.asarray(out_f32), np.asarray(ref), rtol=1e-4, atol=1e-5)
    np.testing.assert_allclose(np.asarray(out_f32).sum(axis=1), np.ones(B),
                               rtol=1e-5, atol=1e-5)          # softmax rows sum to 1

    # bf16 MXU path (v6e/v7x throughput): bf16 weights/activations, f32 accumulate+epilogue.
    fused_bf16 = fold_and_pad_params(params, meta, matmul_dtype=jnp.bfloat16)
    out_bf16 = jax.block_until_ready(classifier_forward(x, cat_list, fused_bf16))
    np.testing.assert_allclose(np.asarray(out_bf16), np.asarray(ref), rtol=5e-2, atol=5e-2)
    np.testing.assert_allclose(np.asarray(out_bf16).sum(axis=1), np.ones(B),
                               rtol=1e-4, atol=1e-4)          # exact division keeps rows normed

    print("KERNEL_OK")
</pallas_src>

<mosaic_0001>
module attributes {stable_mosaic.version = 11 : i64} {
  func.func @_fused_classifier_kernel(%arg0: i32, %arg1: memref<8x32xf32, #tpu.memory_space<vmem>>, %arg2: memref<32x128xf32, #tpu.memory_space<vmem>>, %arg3: memref<1x128xf32, #tpu.memory_space<vmem>>, %arg4: memref<8x128xf32, #tpu.memory_space<vmem>>, %arg5: memref<128x128xf32, #tpu.memory_space<vmem>>, %arg6: memref<1x128xf32, #tpu.memory_space<vmem>>, %arg7: memref<8x128xf32, #tpu.memory_space<vmem>>, %arg8: memref<128x128xf32, #tpu.memory_space<vmem>>, %arg9: memref<1x128xf32, #tpu.memory_space<vmem>>, %arg10: memref<8x128xf32, #tpu.memory_space<vmem>>, %arg11: memref<8x128xf32, #tpu.memory_space<vmem>>) attributes {dimension_semantics = [#tpu.dimension_semantics<parallel>], iteration_bounds = array<i64: 1>, scalar_prefetch = 0 : i64, scratch_operands = 0 : i64, tpu.core_type = #tpu.core_type<tc>, window_params = [{transform_indices = @transform_0, window_bounds = array<i64: 8, 32>}, {pipeline_mode = #tpu.pipeline_mode<synchronous>, transform_indices = @transform_1, window_bounds = array<i64: 32, 128>}, {pipeline_mode = #tpu.pipeline_mode<synchronous>, transform_indices = @transform_2, window_bounds = array<i64: 1, 128>}, {transform_indices = @transform_3, window_bounds = array<i64: 8, 128>}, {pipeline_mode = #tpu.pipeline_mode<synchronous>, transform_indices = @transform_4, window_bounds = array<i64: 128, 128>}, {pipeline_mode = #tpu.pipeline_mode<synchronous>, transform_indices = @transform_5, window_bounds = array<i64: 1, 128>}, {transform_indices = @transform_6, window_bounds = array<i64: 8, 128>}, {pipeline_mode = #tpu.pipeline_mode<synchronous>, transform_indices = @transform_7, window_bounds = array<i64: 128, 128>}, {pipeline_mode = #tpu.pipeline_mode<synchronous>, transform_indices = @transform_8, window_bounds = array<i64: 1, 128>}, {transform_indices = @transform_9, window_bounds = array<i64: 8, 128>}, {transform_indices = @transform_10, window_bounds = array<i64: 8, 128>}]} {
    %c0 = arith.constant 0 : index
    %c0_0 = arith.constant 0 : index
    %0 = vector.load %arg1[%c0, %c0_0] : memref<8x32xf32, #tpu.memory_space<vmem>>, vector<8x32xf32>
    %c0_1 = arith.constant 0 : index
    %c0_2 = arith.constant 0 : index
    %1 = vector.load %arg2[%c0_1, %c0_2] : memref<32x128xf32, #tpu.memory_space<vmem>>, vector<32x128xf32>
    %cst = arith.constant dense<0.000000e+00> : vector<8x128xf32>
    %2 = tpu.matmul %0, %1, %cst {dimension_numbers = #tpu.dot_dimension_numbers<[1], [0], [0], [1], [0, 0, 1, 1], [], []>} : vector<8x32xf32>, vector<32x128xf32>, vector<8x128xf32> -> vector<8x128xf32>
    %c0_3 = arith.constant 0 : index
    %c0_4 = arith.constant 0 : index
    %3 = vector.load %arg4[%c0_3, %c0_4] : memref<8x128xf32, #tpu.memory_space<vmem>>, vector<8x128xf32>
    %4 = arith.addf %2, %3 : vector<8x128xf32>
    %c0_5 = arith.constant 0 : index
    %c0_6 = arith.constant 0 : index
    %5 = vector.load %arg3[%c0_5, %c0_6] : memref<1x128xf32, #tpu.memory_space<vmem>>, vector<1x128xf32>
    %6 = vector.broadcast %5 : vector<1x128xf32> to vector<8x128xf32>
    %7 = arith.addf %4, %6 : vector<8x128xf32>
    %cst_7 = arith.constant 0.000000e+00 : f32
    %8 = vector.broadcast %cst_7 : f32 to vector<8x128xf32>
    %9 = arith.maximumf %7, %8 : vector<8x128xf32>
    %c0_8 = arith.constant 0 : index
    %c0_9 = arith.constant 0 : index
    %10 = vector.load %arg5[%c0_8, %c0_9] : memref<128x128xf32, #tpu.memory_space<vmem>>, vector<128x128xf32>
    %cst_10 = arith.constant dense<0.000000e+00> : vector<8x128xf32>
    %11 = tpu.matmul %9, %10, %cst_10 {dimension_numbers = #tpu.dot_dimension_numbers<[1], [0], [0], [1], [0, 0, 1, 1], [], []>} : vector<8x128xf32>, vector<128x128xf32>, vector<8x128xf32> -> vector<8x128xf32>
    %c0_11 = arith.constant 0 : index
    %c0_12 = arith.constant 0 : index
    %12 = vector.load %arg7[%c0_11, %c0_12] : memref<8x128xf32, #tpu.memory_space<vmem>>, vector<8x128xf32>
    %13 = arith.addf %11, %12 : vector<8x128xf32>
    %c0_13 = arith.constant 0 : index
    %c0_14 = arith.constant 0 : index
    %14 = vector.load %arg6[%c0_13, %c0_14] : memref<1x128xf32, #tpu.memory_space<vmem>>, vector<1x128xf32>
    %15 = vector.broadcast %14 : vector<1x128xf32> to vector<8x128xf32>
    %16 = arith.addf %13, %15 : vector<8x128xf32>
    %cst_15 = arith.constant 0.000000e+00 : f32
    %17 = vector.broadcast %cst_15 : f32 to vector<8x128xf32>
    %18 = arith.maximumf %16, %17 : vector<8x128xf32>
    %c0_16 = arith.constant 0 : index
    %c0_17 = arith.constant 0 : index
    %19 = vector.load %arg8[%c0_16, %c0_17] : memref<128x128xf32, #tpu.memory_space<vmem>>, vector<128x128xf32>
    %cst_18 = arith.constant dense<0.000000e+00> : vector<8x128xf32>
    %20 = tpu.matmul %18, %19, %cst_18 {dimension_numbers = #tpu.dot_dimension_numbers<[1], [0], [0], [1], [0, 0, 1, 1], [], []>} : vector<8x128xf32>, vector<128x128xf32>, vector<8x128xf32> -> vector<8x128xf32>
    %c0_19 = arith.constant 0 : index
    %c0_20 = arith.constant 0 : index
    %21 = vector.load %arg10[%c0_19, %c0_20] : memref<8x128xf32, #tpu.memory_space<vmem>>, vector<8x128xf32>
    %22 = arith.addf %20, %21 : vector<8x128xf32>
    %c0_21 = arith.constant 0 : index
    %c0_22 = arith.constant 0 : index
    %23 = vector.load %arg9[%c0_21, %c0_22] : memref<1x128xf32, #tpu.memory_space<vmem>>, vector<1x128xf32>
    %24 = vector.broadcast %23 : vector<1x128xf32> to vector<8x128xf32>
    %25 = arith.addf %22, %24 : vector<8x128xf32>
    %26 = tpu.iota {dimensions = array<i32: 1>} : vector<8x128xi32>
    %c4_i32 = arith.constant 4 : i32
    %27 = vector.broadcast %c4_i32 : i32 to vector<8x128xi32>
    %28 = arith.cmpi slt, %26, %27 : vector<8x128xi32>
    %cst_23 = arith.constant -1.000000e+30 : f32
    %29 = vector.broadcast %cst_23 : f32 to vector<8x128xf32>
    %30 = arith.select %28, %25, %29 : vector<8x128xi1>, vector<8x128xf32>
    %cst_24 = arith.constant dense<0xFF800000> : vector<8xf32>
    %31 = vector.multi_reduction <maximumf>, %30, %cst_24 [1] : vector<8x128xf32> to vector<8xf32>
    %32 = vector.shape_cast %31 : vector<8xf32> to vector<8x1xf32>
    %33 = vector.broadcast %32 : vector<8x1xf32> to vector<8x128xf32>
    %34 = arith.subf %30, %33 : vector<8x128xf32>
    %35 = math.exp %34 : vector<8x128xf32>
    %cst_25 = arith.constant dense<0.000000e+00> : vector<8xf32>
    %36 = vector.multi_reduction <add>, %35, %cst_25 [1] : vector<8x128xf32> to vector<8xf32>
    %37 = vector.shape_cast %36 : vector<8xf32> to vector<8x1xf32>
    %38 = vector.broadcast %37 : vector<8x1xf32> to vector<8x128xf32>
    %39 = arith.divf %35, %38 : vector<8x128xf32>
    %c0_26 = arith.constant 0 : index
    %c0_27 = arith.constant 0 : index
    %40 = vector.load %arg11[%c0_26, %c0_27] : memref<8x128xf32, #tpu.memory_space<vmem>>, vector<8x128xf32>
    tpu.vector_store %arg11[%c0_26, %c0_27], %39 {strides = array<i32>} : memref<8x128xf32, #tpu.memory_space<vmem>>, vector<8x128xf32>,
    return
  }
  func.func @transform_0(%arg0: i32) -> (i32, i32) {
    %c0_i32 = arith.constant 0 : i32
    %c0_i32_0 = arith.constant 0 : i32
    return %arg0, %c0_i32 : i32, i32
  }
  func.func @transform_1(%arg0: i32) -> (i32, i32) {
    %c0_i32 = arith.constant 0 : i32
    %c0_i32_0 = arith.constant 0 : i32
    %c0_i32_1 = arith.constant 0 : i32
    return %c0_i32, %c0_i32_0 : i32, i32
  }
  func.func @transform_2(%arg0: i32) -> (i32, i32) {
    %c0_i32 = arith.constant 0 : i32
    %c0_i32_0 = arith.constant 0 : i32
    %c0_i32_1 = arith.constant 0 : i32
    return %c0_i32, %c0_i32_0 : i32, i32
  }
  func.func @transform_3(%arg0: i32) -> (i32, i32) {
    %c0_i32 = arith.constant 0 : i32
    %c0_i32_0 = arith.constant 0 : i32
    return %arg0, %c0_i32 : i32, i32
  }
  func.func @transform_4(%arg0: i32) -> (i32, i32) {
    %c0_i32 = arith.constant 0 : i32
    %c0_i32_0 = arith.constant 0 : i32
    %c0_i32_1 = arith.constant 0 : i32
    return %c0_i32, %c0_i32_0 : i32, i32
  }
  func.func @transform_5(%arg0: i32) -> (i32, i32) {
    %c0_i32 = arith.constant 0 : i32
    %c0_i32_0 = arith.constant 0 : i32
    %c0_i32_1 = arith.constant 0 : i32
    return %c0_i32, %c0_i32_0 : i32, i32
  }
  func.func @transform_6(%arg0: i32) -> (i32, i32) {
    %c0_i32 = arith.constant 0 : i32
    %c0_i32_0 = arith.constant 0 : i32
    return %arg0, %c0_i32 : i32, i32
  }
  func.func @transform_7(%arg0: i32) -> (i32, i32) {
    %c0_i32 = arith.constant 0 : i32
    %c0_i32_0 = arith.constant 0 : i32
    %c0_i32_1 = arith.constant 0 : i32
    return %c0_i32, %c0_i32_0 : i32, i32
  }
  func.func @transform_8(%arg0: i32) -> (i32, i32) {
    %c0_i32 = arith.constant 0 : i32
    %c0_i32_0 = arith.constant 0 : i32
    %c0_i32_1 = arith.constant 0 : i32
    return %c0_i32, %c0_i32_0 : i32, i32
  }
  func.func @transform_9(%arg0: i32) -> (i32, i32) {
    %c0_i32 = arith.constant 0 : i32
    %c0_i32_0 = arith.constant 0 : i32
    return %arg0, %c0_i32 : i32, i32
  }
  func.func @transform_10(%arg0: i32) -> (i32, i32) {
    %c0_i32 = arith.constant 0 : i32
    %c0_i32_0 = arith.constant 0 : i32
    return %arg0, %c0_i32 : i32, i32
  }
}

</mosaic_0001>

<bundles_post_ra>
// kernel: tpu_custom_call.1
= control target key start
LH: loop header
LB: loop body
LE: loop exit
PB: predicated region body
PF: predicated region fallthrough
CT: control target
= control target key end

     0   :  { %15 = vsyncpa [#allocation3], 0  ;;  %s883_s0 = inlined_call_operand.hbm [shape: f32[8,32], index: 0, kind: input, shape index: {}]   ;;  %s884_s1 = inlined_call_operand.hbm [shape: f32[32,128], index: 1, kind: input, shape index: {}]   ;;  %s885_s2 = inlined_call_operand.vmem [shape: f32[1,128], index: 2, kind: input, shape index: {}]   ;;  %s886_s3 = inlined_call_operand.vmem [shape: f32[8,128], index: 3, kind: input, shape index: {}]   ;;  %s887_s4 = inlined_call_operand.hbm [shape: f32[128,128], index: 4, kind: input, shape index: {}]   ;;  %s888_s5 = inlined_call_operand.vmem [shape: f32[1,128], index: 5, kind: input, shape index: {}]   ;;  %s889_s6 = inlined_call_operand.vmem [shape: f32[8,128], index: 6, kind: input, shape index: {}]   ;;  %s890_s7 = inlined_call_operand.hbm [shape: f32[128,128], index: 7, kind: input, shape index: {}]   ;;  %s891_s8 = inlined_call_operand.vmem [shape: f32[1,128], index: 8, kind: input, shape index: {}]   ;;  %s892_s9 = inlined_call_operand.vmem [shape: f32[8,128], index: 9, kind: input, shape index: {}]   ;;  %s893_s10 = inlined_call_operand.hbm [shape: f32[8,128], index: 10, kind: output, shape index: {}]  }
   0x1   :  { %16 = vsyncpa [#allocation6], 0 }
   0x2   :  { %17 = vsyncpa [#allocation9], 0 }
   0x3   :  { %18 = vsyncpa [#allocation4], 0  ;;  %s710_s13 = smov [#allocation5]   ;;  %s592_s17 = scalar_lea.hbm %s884_s1, 512 }
   0x4   :  { %s34_s14 = sshll.u32 %s710_s13, 4  ;;  %p593_p0 = scmp.ne.s32.totalorder %s884_s1, %s592_s17  ;;  %s35_s14 = int_to_ptr.vmem [resolvable:$true] %s34_s14 }
   0x5   :  { %p596_p1 = scmp.lt.u32.totalorder %s592_s17, %s884_s1 }
   0x7   :  { %p598_p2 = pnand %p596_p1, %p593_p0 }
   0x9   :  { %601 = shalt.err (!%p598_p2)
}
   0xa   :  { %s602_s22 = scalar_lea.vmem %s35_s14, 512  ;;  %p607_p4 = scmp.lt.s32.totalorder %s35_s14, %s35_s14 }
   0xb   :  { %p603_p3 = scmp.ne.s32.totalorder %s35_s14, %s602_s22  ;;  %p608_p5 = scmp.lt.s32.totalorder %s602_s22, %s602_s22 }
   0xd   :  { %p609_p6 = por %p608_p5, %p607_p4 }
   0xf   :  { %p610_p7 = pnand %p609_p6, %p603_p3 }
  0x11   :  { %613 = shalt.err (!%p610_p7)
}
  0x12   :  { %s711_s23 = smov 128   ;;  %s712_s24 = smov 8  }
  0x13   :  { %40 = dma.hbm_to_vmem [thread:$0]  %s884_s1, 512, %s35_s14, [#allocation6], %s711_s23, %s711_s23, %s712_s24  }
  0x14   :  { %s713_s27 = smov [#allocation2]   ;;  %s714_s29 = smov [#allocation7]  }
  0x15   :  { %s25_s28 = sshll.u32 %s713_s27, 4  ;;  %s50_s30 = sshll.u32 %s714_s29, 4  ;;  %s26_s28 = int_to_ptr.vmem [resolvable:$true] %s25_s28  ;;  %s51_s30 = int_to_ptr.vmem [resolvable:$true] %s50_s30 }
  0x16   :  { %s614_s13 = scalar_lea.hbm %s883_s0, 128 }
  0x17   :  { %p615_p8 = scmp.ne.s32.totalorder %s883_s0, %s614_s13  ;;  %p618_p9 = scmp.lt.u32.totalorder %s614_s13, %s883_s0 }
  0x19   :  { %p620_p10 = pnand %p618_p9, %p615_p8 }
  0x1b   :  { %623 = shalt.err (!%p620_p10)
}
  0x1c   :  { %s624_s1 = scalar_lea.vmem %s26_s28, 128  ;;  %p629_p12 = scmp.lt.s32.totalorder %s26_s28, %s26_s28 }
  0x1d   :  { %p625_p11 = scmp.ne.s32.totalorder %s26_s28, %s624_s1  ;;  %p630_p13 = scmp.lt.s32.totalorder %s624_s1, %s624_s1 }
  0x1f   :  { %p631_p0 = por %p630_p13, %p629_p12 }
  0x21   :  { %p632_p1 = pnand %p631_p0, %p625_p11 }
  0x23   :  { %635 = shalt.err (!%p632_p1)
}
  0x24   :  { %28 = dma.hbm_to_vmem [thread:$0]  %s883_s0, 128, %s26_s28, [#allocation3]  }
  0x25   :  { %s636_s22 = scalar_lea.hbm %s887_s4, 2048 }
  0x26   :  { %p637_p2 = scmp.ne.s32.totalorder %s887_s4, %s636_s22  ;;  %p640_p3 = scmp.lt.u32.totalorder %s636_s22, %s887_s4 }
  0x28   :  { %p642_p4 = pnand %p640_p3, %p637_p2 }
  0x2a   :  { %645 = shalt.err (!%p642_p4)
}
  0x2b   :  { %s646_s11 = scalar_lea.vmem %s51_s30, 2048  ;;  %p651_p6 = scmp.lt.s32.totalorder %s51_s30, %s51_s30 }
  0x2c   :  { %p647_p5 = scmp.ne.s32.totalorder %s51_s30, %s646_s11  ;;  %p652_p7 = scmp.lt.s32.totalorder %s646_s11, %s646_s11 }
  0x2e   :  { %p653_p8 = por %p652_p7, %p651_p6 }
  0x30   :  { %p654_p9 = pnand %p653_p8, %p647_p5 }
  0x32   :  { %657 = shalt.err (!%p654_p9)
}
  0x33   :  { %56 = dma.hbm_to_vmem [thread:$0]  %s887_s4, 2048, %s51_s30, [#allocation6], %s711_s23, %s711_s23, %s712_s24  }
  0x34   :  { %s715_s12 = smov [#allocation8]   ;;  %s658_s17 = scalar_lea.hbm %s890_s7, 2048 }
  0x35   :  { %s66_s13 = sshll.u32 %s715_s12, 4  ;;  %p659_p10 = scmp.ne.s32.totalorder %s890_s7, %s658_s17  ;;  %s67_s13 = int_to_ptr.vmem [resolvable:$true] %s66_s13 }
  0x36   :  { %p662_p11 = scmp.lt.u32.totalorder %s658_s17, %s890_s7 }
  0x38   :  { %p664_p12 = pnand %p662_p11, %p659_p10 }
  0x3a   :  { %667 = shalt.err (!%p664_p12)
}
  0x3b   :  { %s668_s20 = scalar_lea.vmem %s67_s13, 2048  ;;  %p673_p0 = scmp.lt.s32.totalorder %s67_s13, %s67_s13 }
  0x3c   :  { %p669_p13 = scmp.ne.s32.totalorder %s67_s13, %s668_s20  ;;  %p674_p1 = scmp.lt.s32.totalorder %s668_s20, %s668_s20 }
  0x3e   :  { %p675_p2 = por %p674_p1, %p673_p0 }
  0x40   :  { %p676_p3 = pnand %p675_p2, %p669_p13 }
  0x42   :  { %679 = shalt.err (!%p676_p3)
}
  0x43   :  { %72 = dma.hbm_to_vmem [thread:$0]  %s890_s7, 2048, %s67_s13, [#allocation9], %s711_s23, %s711_s23, %s712_s24  }
  0x44   :  { %702 = dma.done.wait [#allocation3], 128  }
  0x45   :  { %703 = vsyncadd [#allocation3], 4294967168 }
  0x46   :  { %704 = dma.done.wait [#allocation6], 2560  }
  0x47   :  { %705 = vsyncadd [#allocation6], 4294964736 }
  0x48   :  { %706 = dma.done.wait [#allocation9], 2048  }
  0x49   :  { %707 = vsyncadd [#allocation9], 4294965248  ;;  %v716_v0 = vmov 0.0|0.0   ;;  %vm717_vm0 = vmmov 0   ;;  %v718_v1 = vmov 0.0   ;;  %v90_v2 = vld [vmem:[#allocation5] sm:$0xff] }
  0x4a   :  { %524 = vmatprep.subr.bf16.mxu0 %v716_v0  ;;  %451 = vmatprep.mubr.msk.f32.mxu0 %vm717_vm0, %v718_v1  ;;  %v91_v3 = vld [vmem:[#allocation5 + $0x8] sm:$0xff]  ;;  %v92_v4 = vld [vmem:[#allocation5 + $0x10] sm:$0xff]  ;;  %v93_v6 = vld [vmem:[#allocation5 + $0x18] sm:$0xff]  ;;  %vm95_vm1 = vcmask 261120  }
  0x4b   :  { %530 = vmatprep.subr.bf16.mxu1 %v716_v0  ;;  %486 = vmatprep.mubr.msk.f32.mxu1 %vm717_vm0, %v718_v1  ;;  %v525_v5 = vpack.c.bf16 %v91_v3, %v90_v2  ;;  %v178_v7 = vld [vmem:[#allocation7] sm:$0xff]  ;;  %v179_v8 = vld [vmem:[#allocation7 + $0x8] sm:$0xff]  ;;  %v180_v9 = vld [vmem:[#allocation7 + $0x10] sm:$0xff]  ;;  %v528_v11 = vpack.c.bf16 %v93_v6, %v92_v4 }
  0x4c   :  { %v181_v10 = vld [vmem:[#allocation7 + $0x18] sm:$0xff]  ;;  %v531_v12 = vpack.c.bf16 %v179_v8, %v178_v7  ;;  %v182_v14 = vld [vmem:[#allocation7 + $0x20] sm:$0xff]  ;;  %v183_v15 = vld [vmem:[#allocation7 + $0x28] sm:$0xff]  ;;  %v369_v8 = vlaneseq }
  0x4d   :  { %526 = vmatpush3.bf16.msra.mxu0 %v525_v5  ;;  %v534_v13 = vpack.c.bf16 %v181_v10, %v180_v9  ;;  %v89_v16 = vld [vmem:[#allocation2] sm:$0xff]  ;;  %v537_v17 = vpack.c.bf16 %v183_v15, %v182_v14  ;;  %v184_v18 = vld [vmem:[#allocation7 + $0x30] sm:$0xff]  ;;  %v186_v21 = vld [vmem:[#allocation7 + $0x40] sm:$0xff] }
  0x4e   :  { %527 = vmatprep.subr.bf16.mxu0 %v716_v0  ;;  %532 = vmatpush3.bf16.msra.mxu1 %v531_v12  ;;  %v185_v19 = vld [vmem:[#allocation7 + $0x38] sm:$0xff]  ;;  %v187_v22 = vld [vmem:[#allocation7 + $0x48] sm:$0xff]  ;;  %v188_v24 = vld [vmem:[#allocation7 + $0x50] sm:$0xff]  ;;  %v370_v9 = vand.u32 127, %v369_v8 }
  0x4f   :  { %533 = vmatprep.subr.bf16.mxu1 %v716_v0  ;;  %v540_v20 = vpack.c.bf16 %v185_v19, %v184_v18  ;;  %v543_v23 = vpack.c.bf16 %v187_v22, %v186_v21  ;;  %v189_v25 = vld [vmem:[#allocation7 + $0x58] sm:$0xff]  ;;  %v190_v27 = vld [vmem:[#allocation7 + $0x60] sm:$0xff]  ;;  %v191_v28 = vld [vmem:[#allocation7 + $0x68] sm:$0xff] }
  0x50   :  { %v546_v26 = vpack.c.bf16 %v189_v25, %v188_v24  ;;  %v549_v29 = vpack.c.bf16 %v191_v28, %v190_v27  ;;  %v192_v30 = vld [vmem:[#allocation7 + $0x70] sm:$0xff]  ;;  %v193_v31 = vld [vmem:[#allocation7 + $0x78] sm:$0xff]  ;;  %v274_v33 = vld [vmem:[#allocation8] sm:$0xff]  ;;  %vm371_vm2 = vcmp.lt.s32.totalorder %v370_v9, 4 }
  0x51   :  { %529 = vmatpush3.bf16.msra.mxu0 %v528_v11  ;;  %v552_v32 = vpack.c.bf16 %v193_v31, %v192_v30  ;;  %v275_v34 = vld [vmem:[#allocation8 + $0x8] sm:$0xff]  ;;  %v276_v35 = vld [vmem:[#allocation8 + $0x10] sm:$0xff]  ;;  %v277_v37 = vld [vmem:[#allocation8 + $0x18] sm:$0xff] }
  0x52   :  { %554 = vmatprep.subr.bf16.mxu0 %v716_v0  ;;  %535 = vmatpush3.bf16.msra.mxu1 %v534_v13  ;;  %v555_v36 = vpack.c.bf16 %v275_v34, %v274_v33  ;;  %v558_v38 = vpack.c.bf16 %v277_v37, %v276_v35  ;;  %v278_v39 = vld [vmem:[#allocation8 + $0x20] sm:$0xff]  ;;  %v279_v40 = vld [vmem:[#allocation8 + $0x28] sm:$0xff]  ;;  %v280_v42 = vld [vmem:[#allocation8 + $0x30] sm:$0xff] }
  0x53   :  { %536 = vmatprep.subr.bf16.mxu1 %v716_v0  ;;  %v561_v41 = vpack.c.bf16 %v279_v40, %v278_v39  ;;  %v281_v43 = vld [vmem:[#allocation8 + $0x38] sm:$0xff]  ;;  %v282_v45 = vld [vmem:[#allocation8 + $0x40] sm:$0xff]  ;;  %v283_v46 = vld [vmem:[#allocation8 + $0x48] sm:$0xff] }
  0x54   :  { %452 = vmatmul.mubr.msk.f32.vlgmr.msra.gmra.mrb[0].mxu0 %vm95_vm1, %v89_v16  ;;  %v564_v44 = vpack.c.bf16 %v281_v43, %v280_v42  ;;  %v567_v47 = vpack.c.bf16 %v283_v46, %v282_v45  ;;  %v284_v48 = vld [vmem:[#allocation8 + $0x50] sm:$0xff]  ;;  %v285_v49 = vld [vmem:[#allocation8 + $0x58] sm:$0xff]  ;;  %v286_v58 = vld [vmem:[#allocation8 + $0x60] sm:$0xff] }
  0x55   :  { %521 = vmatprep.mubr.msk.f32.mxu0 %vm717_vm0, %v718_v1  ;;  %556 = vmatpush3.bf16.msra.mxu0 %v555_v36  ;;  %v570_v50 = vpack.c.bf16 %v285_v49, %v284_v48  ;;  %v94_v51 = vld [vmem:[%s886_s3] sm:$0xff]  ;;  %v287_v59 = vld [vmem:[#allocation8 + $0x68] sm:$0xff]  ;;  %v288_v61 = vld [vmem:[#allocation8 + $0x70] sm:$0xff] }
  0x56   :  { %538 = vmatpush3.bf16.msra.mxu1 %v537_v17  ;;  %557 = vmatprep.subr.bf16.mxu0 %v716_v0  ;;  %v401_v53 = vld [vmem:[%s885_s2] ss:$0 sm:$0xff]  ;;  %v573_v60 = vpack.c.bf16 %v287_v59, %v286_v58 }
  0x57   :  { %539 = vmatprep.subr.bf16.mxu1 %v716_v0  ;;  %v289_v62 = vld [vmem:[#allocation8 + $0x78] sm:$0xff] }
  0x58   :  { %v576_v63 = vpack.c.bf16 %v289_v62, %v288_v61  ;;  %v194_v1 = vld [vmem:[%s889_s6] sm:$0xff] }
  0x59   :  { %559 = vmatpush3.bf16.msra.mxu0 %v558_v38  ;;  %v402_v3 = vld [vmem:[%s888_s5] ss:$0 sm:$0xff]  ;;  %s719_s5 = smov [#allocation10]  }
  0x5a   :  { %541 = vmatpush3.bf16.msra.mxu1 %v540_v20  ;;  %560 = vmatprep.subr.bf16.mxu0 %v716_v0  ;;  %v403_v11 = vld [vmem:[%s891_s8] ss:$0 sm:$0xff]  ;;  %s389_s6 = sshll.u32 %s719_s5, 4  ;;  %s390_s6 = int_to_ptr.vmem [resolvable:$true] %s389_s6 }
  0x5b   :  { %542 = vmatprep.subr.bf16.mxu1 %v716_v0  ;;  %s680_s8 = scalar_lea.vmem %s390_s6, 128  ;;  %p685_p5 = scmp.lt.s32.totalorder %s390_s6, %s390_s6 }
  0x5c   :  { %p681_p4 = scmp.ne.s32.totalorder %s390_s6, %s680_s8  ;;  %p686_p6 = scmp.lt.s32.totalorder %s680_s8, %s680_s8 }
  0x5d   :  { %562 = vmatpush3.bf16.msra.mxu0 %v561_v41 }
  0x5e   :  { %544 = vmatpush3.bf16.msra.mxu1 %v543_v23  ;;  %563 = vmatprep.subr.bf16.mxu0 %v716_v0  ;;  %p687_p7 = por %p686_p6, %p685_p5 }
  0x5f   :  { %545 = vmatprep.subr.bf16.mxu1 %v716_v0 }
  0x60   :  { %p688_p8 = pnand %p687_p7, %p681_p4 }
  0x61   :  { %565 = vmatpush3.bf16.msra.mxu0 %v564_v44 }
  0x62   :  { %547 = vmatpush3.bf16.msra.mxu1 %v546_v26  ;;  %566 = vmatprep.subr.bf16.mxu0 %v716_v0 }
  0x63   :  { %548 = vmatprep.subr.bf16.mxu1 %v716_v0 }
  0x65   :  { %568 = vmatpush3.bf16.msra.mxu0 %v567_v47 }
  0x66   :  { %550 = vmatpush3.bf16.msra.mxu1 %v549_v29  ;;  %569 = vmatprep.subr.bf16.mxu0 %v716_v0 }
  0x67   :  { %551 = vmatprep.subr.bf16.mxu1 %v716_v0 }
  0x69   :  { %571 = vmatpush3.bf16.msra.mxu0 %v570_v50 }
  0x6a   :  { %553 = vmatpush3.bf16.msra.mxu1 %v552_v32  ;;  %572 = vmatprep.subr.bf16.mxu0 %v716_v0 }
  0x6d   :  { %574 = vmatpush3.bf16.msra.mxu0 %v573_v60 }
  0x6e   :  { %575 = vmatprep.subr.bf16.mxu0 %v716_v0  ;;  %v290_v0 = vld [vmem:[%s892_s9] sm:$0xff] }
  0x71   :  { %577 = vmatpush3.bf16.msra.mxu0 %v576_v63 }
 0x127   :  { %v165_v52 = vpop.f32.mrb[0].mxu0 }
 0x128   :  { %v166_v54 = vadd.f32 %v165_v52, %v94_v51  ;;  %v453_v55 = vpop.f32.mrb[1].mxu0 }
 0x12a   :  { %v176_v56 = vadd.f32 %v401_v53, %v166_v54 }
 0x12c   :  { %v177_v57 = vmax.f32 %v176_v56, 0.0 }
 0x12e   :  { %487 = vmatmul.mubr.f32.vlgmr.msra.gmra.mrb[0].mxu1 %v177_v57 }
 0x201   :  { %v261_v2 = vpop.f32.mrb[0].mxu1 }
 0x202   :  { %v262_v4 = vadd.f32 %v261_v2, %v194_v1  ;;  %v488_v5 = vpop.f32.mrb[1].mxu1 }
 0x204   :  { %v272_v6 = vadd.f32 %v402_v3, %v262_v4 }
 0x206   :  { %v273_v7 = vmax.f32 %v272_v6, 0.0 }
 0x208   :  { %522 = vmatmul.mubr.f32.vlgmr.msra.gmra.mrb[2].mxu0 %v273_v7 }
 0x2db   :  { %v357_v10 = vpop.f32.mrb[2].mxu0 }
 0x2dc   :  { %v358_v12 = vadd.f32 %v357_v10, %v290_v0  ;;  %v523_v13 = vpop.f32.mrb[3].mxu0 }
 0x2de   :  { %v368_v14 = vadd.f32 %v403_v11, %v358_v12 }
 0x2e0   :  { %v372_v15 = vsel %vm371_vm2, %v368_v14, -1e+30 }
 0x2e1   :  { %373 = vmax.xlane.f32.xlu0 %v372_v15 }
 0x36e   :  { %v374_v16 = vpop.xlane.xlu0 %373 }
 0x36f   :  { %v375_v17 = vsub.f32 %v372_v15, %v374_v16 }
 0x371   :  { %v376_v18 = vmul.f32 1.442695, %v375_v17 }
 0x373   :  { %588 = vpow2.f32 %v376_v18 }
 0x37d   :  { %v589_v19 = vpop.eup %588 }
 0x37e   :  { %378 = vadd.xlane.f32.xlu0 %v589_v19 }
 0x40b   :  { %v379_v20 = vpop.xlane.xlu0 %378 }
 0x40c   :  { %590 = vrcp.f32 %v379_v20 }
 0x416   :  { %v591_v21 = vpop.eup %590 }
 0x417   :  { %v381_v22 = vmul.f32 %v591_v21, %v589_v19 }
 0x419   :  { %382 = vst [vmem:[#allocation10] sm:$0xff] %v381_v22 }
 0x41a   :  { %691 = shalt.err (!%p688_p8)
}
 0x41b   :  { %s692_s28 = scalar_lea.hbm %s893_s10, 128 }
 0x41c   :  { %p693_p9 = scmp.ne.s32.totalorder %s893_s10, %s692_s28  ;;  %p696_p10 = scmp.lt.u32.totalorder %s692_s28, %s893_s10 }
 0x41e   :  { %p698_p11 = pnand %p696_p10, %p693_p9 }
 0x420   :  { %701 = shalt.err (!%p698_p11)
}
 0x421   :  { %392 = dma.vmem_to_hbm [thread:$0]  %s390_s6, 128, %s893_s10, [#allocation4]  }
 0x422   :  { %708 = dma.done.wait [#allocation4], 128  }
 0x423   :  { %709 = vsyncadd [#allocation4], 4294967168 }
 0x424   :  { %396 = vsyncpa [#allocation3], 1 }
 0x425   :  { %397 = vsyncpa [#allocation6], 1 }
 0x426   :  { %398 = vsyncpa [#allocation9], 1 }
 0x427   :  { %399 = vsyncpa [#allocation4], 1 }

</bundles_post_ra>
